<compile_context>
chip_gen: v5e
topology: v5e:2x2
jax: 0.10.0
libtpu: 0.0.40
codegen_flags: <defaults>
</compile_context>

<pallas_src>
import math

import jax
import jax.numpy as jnp
from jax.experimental import pallas as pl
from jax.experimental.pallas import tpu as pltpu

_TARGET_TILE_BYTES = 4 * 1024 * 1024      # ~4 MiB per tile (fits all generations)
_BYPASS_BYTES = 1 * 1024 * 1024           # below this, plain JAX wins
_MAX_COLS = 32768                          # lane-dense slab width cap


def _scale_kernel(bias_ref, x_ref, o_ref):
    """o = x * bias ; bias is a (1,) f32 scalar in SMEM, cast once to x dtype."""
    o_ref[...] = x_ref[...] * bias_ref[0].astype(x_ref.dtype)


def _sublane_unit(dtype) -> int:
    """Packed sublane group size: 8 rows for 32-bit, 16 for 16-bit, 32 for 8-bit."""
    bits = jnp.dtype(dtype).itemsize * 8
    return {32: 8, 16: 16, 8: 32}.get(bits, 8)


def _largest_lane_cols(total: int, cap: int = _MAX_COLS) -> int:
    """Largest multiple of 128 that divides `total`, capped at `cap`.
    Caller guarantees total % 128 == 0."""
    q = total // 128
    d_max = min(q, cap // 128)
    for d in range(d_max, 0, -1):
        if q % d == 0:
            return 128 * d
    return 128


def learnable_coefficient(x, bias, *, force_pallas: bool = False):
    """Pallas equivalent of LearnableCoefficient.forward: out = x * bias (scalar)."""
    orig_shape = x.shape
    dtype = x.dtype
    itemsize = jnp.dtype(dtype).itemsize
    total = int(math.prod(orig_shape)) if orig_shape else 1
    bias = jnp.asarray(bias, dtype=jnp.float32).reshape((1,))

    # --- small-input bypass: launch overhead would dominate a tiny stream ----
    if (total * itemsize < _BYPASS_BYTES) and not force_pallas:
        return (x * bias[0].astype(dtype)).astype(dtype)

    # --- lane-dense 2-D slab ------------------------------------------------
    if total % 128 == 0:
        cols = _largest_lane_cols(total)
        rows = total // cols
    else:
        # Irregular element count: single contiguous row; edge block is masked.
        rows, cols = 1, total
    x2 = x.reshape(rows, cols)

    unit = _sublane_unit(dtype)

    # Column tile: full width when it fits the budget, else chunks of 128 lanes.
    if cols * itemsize <= _TARGET_TILE_BYTES or cols <= 128:
        tile_c = cols
    else:
        tile_c = max(128, (_TARGET_TILE_BYTES // itemsize) // 128 * 128)
        tile_c = min(tile_c, (cols // 128) * 128)

    # Row tile: as many rows as fit the budget, aligned to the packed sublane unit.
    row_bytes = tile_c * itemsize
    budget_rows = max(1, _TARGET_TILE_BYTES // row_bytes)
    if budget_rows >= rows:
        tile_r = rows                                  # full extent -> always legal
    elif budget_rows >= unit:
        tile_r = (budget_rows // unit) * unit          # multiple of sublane unit
    else:
        tile_r = min(unit, rows)                       # at least one packed group

    grid_r = pl.cdiv(rows, tile_r)
    grid_c = pl.cdiv(cols, tile_c)
    # Make sure a parallel axis has >= 2 steps when possible (v7x megacore).
    if grid_r * grid_c == 1 and rows >= 2 * unit:
        tile_r = max(unit, ((rows // 2) // unit) * unit)
        grid_r = pl.cdiv(rows, tile_r)
    grid = (grid_r, grid_c)

    tile_bytes = tile_r * tile_c * itemsize
    # 2 operands (in + out) x 2 pipeline buffers x tile bytes, plus slack.
    vmem_limit = min(48 * 1024 * 1024,
                     max(32 * 1024 * 1024, int(4 * tile_bytes * 1.5)))

    out2 = pl.pallas_call(
        _scale_kernel,
        out_shape=jax.ShapeDtypeStruct((rows, cols), dtype),
        grid=grid,
        in_specs=[
            # scalar parameter: whole (1,) array in SMEM, available every step
            pl.BlockSpec(memory_space=pltpu.MemorySpace.SMEM),
            pl.BlockSpec((tile_r, tile_c), lambda i, j: (i, j)),
        ],
        out_specs=pl.BlockSpec((tile_r, tile_c), lambda i, j: (i, j)),
        compiler_params=pltpu.CompilerParams(
            dimension_semantics=("parallel", "parallel"),
            vmem_limit_bytes=vmem_limit,
        ),
        cost_estimate=pl.CostEstimate(
            flops=total,
            bytes_accessed=2 * total * itemsize,
            transcendentals=0,
        ),
    )(bias, x2)

    return out2.reshape(orig_shape)


class LearnableCoefficient:
    """Mirror of the PyTorch module: holds a scalar bias initialized to 1.0."""
    # TODO(synk): PyTorch type promotion (e.g. bf16 * f32-param -> f32) is not
    # replicated; output keeps the input dtype.

    def __init__(self, bias: float = 1.0):
        self.bias = jnp.array([bias], dtype=jnp.float32)

    def __call__(self, x):
        return learnable_coefficient(x, self.bias)


if __name__ == "__main__":
    key = jax.random.PRNGKey(0)
    x = jax.random.normal(key, (2, 4, 16, 16), dtype=jnp.float32)

    # Default-initialized module (bias = 1.0); tiny input takes the JAX bypass.
    mod = LearnableCoefficient()
    out_bypass = jax.block_until_ready(mod(x))
    assert out_bypass.shape == x.shape and out_bypass.dtype == x.dtype
    assert jnp.allclose(out_bypass, x), "mismatch vs reference (bias=1.0, bypass)"

    # Force the Pallas kernel on the small spec shape to validate it on TPU.
    out_pallas = jax.block_until_ready(
        learnable_coefficient(x, jnp.array([0.731], jnp.float32), force_pallas=True)
    )
    assert out_pallas.shape == x.shape and out_pallas.dtype == x.dtype
    assert jnp.allclose(out_pallas, x * jnp.float32(0.731), atol=1e-6), \
        "mismatch vs reference (bias=0.731, pallas)"

    # Larger tensor exercises the multi-step pipelined Pallas path by default.
    mod2 = LearnableCoefficient(bias=0.731)
    xl = jax.random.normal(jax.random.PRNGKey(1), (8, 32, 64, 64), dtype=jnp.float32)
    out_l = jax.block_until_ready(mod2(xl))
    assert jnp.allclose(out_l, xl * jnp.float32(0.731), atol=1e-6), \
        "mismatch vs reference (bias=0.731, large)"

    print("KERNEL_OK")
</pallas_src>

<mosaic_0001>
module attributes {stable_mosaic.version = 11 : i64} {
  func.func @_scale_kernel(%arg0: i32, %arg1: i32, %arg2: memref<1xf32, #tpu.memory_space<smem>>, %arg3: memref<1x2048xf32, #tpu.memory_space<vmem>>, %arg4: memref<1x2048xf32, #tpu.memory_space<vmem>>) attributes {dimension_semantics = [#tpu.dimension_semantics<parallel>, #tpu.dimension_semantics<parallel>], iteration_bounds = array<i64: 1, 1>, scalar_prefetch = 0 : i64, scratch_operands = 0 : i64, tpu.core_type = #tpu.core_type<tc>, window_params = [{transform_indices = @transform_0, window_bounds = array<i64: 1>}, {transform_indices = @transform_1, window_bounds = array<i64: 1, 2048>}, {transform_indices = @transform_2, window_bounds = array<i64: 1, 2048>}]} {
    %c0 = arith.constant 0 : index
    %c0_0 = arith.constant 0 : index
    %0 = vector.load %arg3[%c0, %c0_0] : memref<1x2048xf32, #tpu.memory_space<vmem>>, vector<1x2048xf32>
    %c0_1 = arith.constant 0 : index
    %1 = memref.load %arg2[%c0_1] : memref<1xf32, #tpu.memory_space<smem>>
    %2 = vector.broadcast %1 : f32 to vector<1x2048xf32>
    %3 = arith.mulf %0, %2 : vector<1x2048xf32>
    %c0_2 = arith.constant 0 : index
    %c0_3 = arith.constant 0 : index
    %4 = vector.load %arg4[%c0_2, %c0_3] : memref<1x2048xf32, #tpu.memory_space<vmem>>, vector<1x2048xf32>
    tpu.vector_store %arg4[%c0_2, %c0_3], %3 {strides = array<i32>} : memref<1x2048xf32, #tpu.memory_space<vmem>>, vector<1x2048xf32>,
    return
  }
  func.func @transform_0(%arg0: i32, %arg1: i32) -> i32 {
    %c0_i32 = arith.constant 0 : i32
    %c0_i32_0 = arith.constant 0 : i32
    return %c0_i32 : i32
  }
  func.func @transform_1(%arg0: i32, %arg1: i32) -> (i32, i32) {
    %c0_i32 = arith.constant 0 : i32
    return %arg0, %arg1 : i32, i32
  }
  func.func @transform_2(%arg0: i32, %arg1: i32) -> (i32, i32) {
    %c0_i32 = arith.constant 0 : i32
    return %arg0, %arg1 : i32, i32
  }
}

</mosaic_0001>

<bundles_post_ra>
// kernel: tpu_custom_call.1
= control target key start
LH: loop header
LB: loop body
LE: loop exit
PB: predicated region body
PF: predicated region fallthrough
CT: control target
= control target key end

     0   :  { %8 = vsyncpa [#allocation4], 0  ;;  %s132_s0 = inlined_call_operand.<no memory space> [shape: f32[1], index: 0, kind: input, shape index: {}]   ;;  %s133_s1 = inlined_call_operand.hbm [shape: f32[1,2048], index: 1, kind: input, shape index: {}]   ;;  %s134_s2 = inlined_call_operand.hbm [shape: f32[1,2048], index: 2, kind: output, shape index: {}]  }
   0x1   :  { %9 = vsyncpa [#allocation5], 0  ;;  %s17_s11 = sshll.u32 %s133_s1, 4  ;;  %s106_s12 = smov [#allocation3]   ;;  %s18_s11 = int_to_ptr.hbm [resolvable:$true] %s17_s11 }
   0x2   :  { %s19_s13 = sshll.u32 %s106_s12, 4  ;;  %s20_s13 = int_to_ptr.vmem [resolvable:$true] %s19_s13 }
   0x3   :  { %22 = dma.hbm_to_vmem [thread:$0]  %s18_s11, 256, %s20_s13, [#allocation4]  }
   0x4   :  { %102 = dma.done.wait [#allocation4], 256  }
   0x5   :  { %103 = vsyncadd [#allocation4], 4294967040  ;;  %v30_v0 = vstv %s132_s0  ;;  %s107_s16 = smov [#allocation6]   ;;  %s42_s20 = sshll.u32 %s134_s2, 4  ;;  %v27_v1 = vld [vmem:[#allocation3] sm:$0xff]  ;;  %v28_v2 = vld [vmem:[#allocation3 + $0x8] sm:$0xff]  ;;  %s43_s20 = int_to_ptr.hbm [resolvable:$true] %s42_s20 }
   0x6   :  { %s40_s17 = sshll.u32 %s107_s16, 4  ;;  %v31_v3 = vmul.f32 %v30_v0, %v27_v1  ;;  %v32_v4 = vmul.f32 %v30_v0, %v28_v2  ;;  %s41_s17 = int_to_ptr.vmem [resolvable:$true] %s40_s17 }
   0x8   :  { %33 = vst [vmem:[#allocation6] sm:$0xff] %v31_v3 }
   0x9   :  { %34 = vst [vmem:[#allocation6 + $0x8] sm:$0xff] %v32_v4 }
   0xa   :  { %45 = dma.vmem_to_hbm [thread:$0]  %s41_s17, 256, %s43_s20, [#allocation5]  }
   0xb   :  { %104 = dma.done.wait [#allocation5], 256  }
   0xc   :  { %105 = vsyncadd [#allocation5], 4294967040 }
   0xd   :  { %50 = vsyncpa [#allocation4], 1 }
   0xe   :  { %51 = vsyncpa [#allocation5], 1 }

</bundles_post_ra>
